<compile_context>
chip_gen: v5e
topology: v5e:2x2
jax: 0.10.0
libtpu: 0.0.40
codegen_flags: <defaults>
</compile_context>

<pallas_src>
import jax
import jax.numpy as jnp
from jax.experimental import pallas as pl
from jax.experimental.pallas import tpu as pltpu

_EPS = 1e-5


def _channel_att_kernel(x_ref, g_ref, b_ref, o_ref):
    # x_ref: (Nb, Cb, L) block; g_ref / b_ref: (1, Cb, 1) folded affine params.
    n, _, l = x_ref.shape
    inv_m = 1.0 / float(n * l)  # per-channel element count (no spatial tiling)

    xf = x_ref[...].astype(jnp.float32)

    # --- pass 1: per-channel sum and sum-of-squares (single sweep) ---
    s1 = jnp.sum(xf, axis=(0, 2), keepdims=True)          # (1, Cb, 1)
    s2 = jnp.sum(xf * xf, axis=(0, 2), keepdims=True)     # (1, Cb, 1)
    mean = s1 * inv_m
    # E[x^2] - mean^2 in f32, clamped at 0 (cancellation guard) before rsqrt.
    var = jnp.maximum(s2 * inv_m - mean * mean, 0.0)

    scale = g_ref[...].astype(jnp.float32) * jax.lax.rsqrt(var + _EPS)  # (1,Cb,1)
    bias = b_ref[...].astype(jnp.float32) - mean * scale                # fold mean

    # --- pass 2: fused affine + gate + residual multiply ---
    y = xf * scale + bias
    gate = 0.5 * (jnp.tanh(0.5 * y) + 1.0)   # == sigmoid(y), 1 EUP op instead of 2
    o_ref[...] = (gate * xf).astype(o_ref.dtype)


def _scoped_vmem_limit_bytes():
    """Generation-aware scoped-VMEM limit: ~5/8 of physical, capped at 80 MiB
    (-> ~40 MiB on v7x's 64 MiB/TC, 80 MiB on v5e/v6e's 128 MiB)."""
    cap = 64 << 20  # conservative default = v7x per-TensorCore VMEM
    try:
        info = pltpu.get_tpu_info()
        cap = int(getattr(info, "vmem_capacity_bytes", cap)) or cap
    except Exception:
        pass
    return min((cap * 5) // 8, 80 << 20)


def _pick_channel_block(C, bytes_per_channel, itemsize, target_bytes, min_steps=4):
    """Pick (cb, grid) so each (*, cb, L) block stays under `target_bytes`,
    cb satisfies the (8,128) second-minor rule (multiple of 8/16/32 depending
    on dtype packing, or cb == C), and the grid has >= min_steps steps when C
    allows (pipelining + v7x megacore)."""
    mult = max(8, 32 // max(1, itemsize))  # 8 for f32, 16 for bf16, 32 for int8
    cands = sorted({d for d in range(mult, C + 1, mult) if C % d == 0} | {C})
    fitting = [d for d in cands if d * bytes_per_channel <= target_bytes]
    if fitting:
        pipelined = [d for d in fitting if C // d >= min_steps]
        cb = max(pipelined) if pipelined else max(fitting)
        return cb, pl.cdiv(C, cb)
    # No exact divisor fits the budget: use a non-dividing multiple-of-`mult`
    # block; the trailing partial block's OOB reads are ignored (channels are
    # independent) and its OOB stores are masked by Pallas.
    cb = (target_bytes // bytes_per_channel // mult) * mult
    cb = max(cb, mult)
    cb = min(cb, C)
    # TODO(synk): if even a `mult`-channel slab exceeds the VMEM budget, a
    # spatial-tiled two-pass stats kernel is required.
    return cb, pl.cdiv(C, cb)


def att_forward(x_nchw, gamma, beta):
    """x_nchw: (N, C, H, W); gamma/beta: (C,) BN affine params."""
    N, C, H, W = x_nchw.shape
    HW = H * W
    itemsize = jnp.dtype(x_nchw.dtype).itemsize

    # weight_bn = |gamma| / sum(|gamma|); fold into both gamma and beta:
    #   sigmoid(wbn * (gamma*x_hat + beta)) == sigmoid(g'*x_hat + b')
    absg = jnp.abs(gamma)
    wbn = absg / jnp.sum(absg)
    gp = (wbn * gamma).astype(jnp.float32).reshape(1, C, 1)
    bp = (wbn * beta).astype(jnp.float32).reshape(1, C, 1)

    # Layout: keep native NCHW view (N, C, HW) when HW is lane-dense; otherwise
    # pay a one-time transpose to channel-major (1, C, N*HW) so output stores
    # are unmasked full-lane vst.
    channel_major = (HW % 128) != 0
    if channel_major:
        x_view = jnp.transpose(x_nchw.reshape(N, C, HW), (1, 0, 2)).reshape(1, C, N * HW)
        nb, lane = 1, N * HW
    else:
        x_view = x_nchw.reshape(N, C, HW)   # free view, no data movement
        nb, lane = N, HW

    vmem_limit = _scoped_vmem_limit_bytes()
    target_bytes = vmem_limit // 6  # double-buffered in+out ~= 4x block, + headroom
    cb, steps = _pick_channel_block(C, N * HW * itemsize, itemsize, target_bytes)

    out_view = pl.pallas_call(
        _channel_att_kernel,
        out_shape=jax.ShapeDtypeStruct((nb, C, lane), x_nchw.dtype),
        grid_spec=pltpu.PrefetchScalarGridSpec(
            num_scalar_prefetch=0,
            grid=(steps,),
            in_specs=[
                pl.BlockSpec((nb, cb, lane), lambda c: (0, c, 0)),  # x block
                pl.BlockSpec((1, cb, 1), lambda c: (0, c, 0)),      # g' = wbn*gamma
                pl.BlockSpec((1, cb, 1), lambda c: (0, c, 0)),      # b' = wbn*beta
            ],
            out_specs=pl.BlockSpec((nb, cb, lane), lambda c: (0, c, 0)),
        ),
        compiler_params=pltpu.CompilerParams(
            dimension_semantics=("parallel",),
            vmem_limit_bytes=vmem_limit,
        ),
    )(x_view, gp, bp)

    if channel_major:
        out = jnp.transpose(out_view.reshape(C, N, HW), (1, 0, 2)).reshape(N, C, H, W)
    else:
        out = out_view.reshape(N, C, H, W)
    return out


def _reference(x, gamma, beta):
    # pure-JAX reference mirroring the PyTorch module (training-mode BN)
    mean = jnp.mean(x, axis=(0, 2, 3), keepdims=True)
    var = jnp.mean((x - mean) ** 2, axis=(0, 2, 3), keepdims=True)
    x_hat = (x - mean) / jnp.sqrt(var + _EPS)
    bn = gamma[None, :, None, None] * x_hat + beta[None, :, None, None]
    wbn = jnp.abs(gamma) / jnp.sum(jnp.abs(gamma))
    return jax.nn.sigmoid(wbn[None, :, None, None] * bn) * x


if __name__ == "__main__":
    key = jax.random.PRNGKey(0)
    kx, kg, kb = jax.random.split(key, 3)

    N, C, H, W = 2, 4, 16, 16
    x = jax.random.normal(kx, (N, C, H, W), dtype=jnp.float32)
    # deterministic synthetic BN parameters (module __init__: affine=True -> (C,) each)
    gamma = 1.0 + 0.1 * jax.random.normal(kg, (C,), dtype=jnp.float32)
    beta = 0.1 * jax.random.normal(kb, (C,), dtype=jnp.float32)

    out = att_forward(x, gamma, beta)
    out = jax.block_until_ready(out)

    ref = _reference(x, gamma, beta)
    assert out.shape == (N, C, H, W)
    assert jnp.allclose(out, ref, atol=1e-5, rtol=1e-5), "mismatch vs reference"

    print("KERNEL_OK")
</pallas_src>

<mosaic_0001>
module attributes {stable_mosaic.version = 11 : i64} {
  func.func @_channel_att_kernel(%arg0: i32, %arg1: memref<2x4x256xf32, #tpu.memory_space<vmem>>, %arg2: memref<1x4x1xf32, #tpu.memory_space<vmem>>, %arg3: memref<1x4x1xf32, #tpu.memory_space<vmem>>, %arg4: memref<2x4x256xf32, #tpu.memory_space<vmem>>) attributes {dimension_semantics = [#tpu.dimension_semantics<parallel>], iteration_bounds = array<i64: 1>, scalar_prefetch = 0 : i64, scratch_operands = 0 : i64, tpu.core_type = #tpu.core_type<tc>, window_params = [{transform_indices = @transform_0, window_bounds = array<i64: 2, 4, 256>}, {transform_indices = @transform_1, window_bounds = array<i64: 1, 4, 1>}, {transform_indices = @transform_2, window_bounds = array<i64: 1, 4, 1>}, {transform_indices = @transform_3, window_bounds = array<i64: 2, 4, 256>}]} {
    %c0 = arith.constant 0 : index
    %c0_0 = arith.constant 0 : index
    %c0_1 = arith.constant 0 : index
    %0 = vector.load %arg1[%c0, %c0_0, %c0_1] : memref<2x4x256xf32, #tpu.memory_space<vmem>>, vector<2x4x256xf32>
    %cst = arith.constant dense<0.000000e+00> : vector<4xf32>
    %1 = vector.multi_reduction <add>, %0, %cst [0, 2] : vector<2x4x256xf32> to vector<4xf32>
    %2 = vector.shape_cast %1 : vector<4xf32> to vector<1x4x1xf32>
    %3 = arith.mulf %0, %0 : vector<2x4x256xf32>
    %cst_2 = arith.constant dense<0.000000e+00> : vector<4xf32>
    %4 = vector.multi_reduction <add>, %3, %cst_2 [0, 2] : vector<2x4x256xf32> to vector<4xf32>
    %5 = vector.shape_cast %4 : vector<4xf32> to vector<1x4x1xf32>
    %cst_3 = arith.constant 0.001953125 : f32
    %6 = vector.broadcast %cst_3 : f32 to vector<1x4x1xf32>
    %7 = arith.mulf %2, %6 : vector<1x4x1xf32>
    %cst_4 = arith.constant 0.001953125 : f32
    %8 = vector.broadcast %cst_4 : f32 to vector<1x4x1xf32>
    %9 = arith.mulf %5, %8 : vector<1x4x1xf32>
    %10 = arith.mulf %7, %7 : vector<1x4x1xf32>
    %11 = arith.subf %9, %10 : vector<1x4x1xf32>
    %cst_5 = arith.constant 0.000000e+00 : f32
    %12 = vector.broadcast %cst_5 : f32 to vector<1x4x1xf32>
    %13 = arith.maximumf %11, %12 : vector<1x4x1xf32>
    %c0_6 = arith.constant 0 : index
    %c0_7 = arith.constant 0 : index
    %c0_8 = arith.constant 0 : index
    %14 = vector.load %arg2[%c0_6, %c0_7, %c0_8] : memref<1x4x1xf32, #tpu.memory_space<vmem>>, vector<1x4x1xf32>
    %cst_9 = arith.constant 9.99999974E-6 : f32
    %15 = vector.broadcast %cst_9 : f32 to vector<1x4x1xf32>
    %16 = arith.addf %13, %15 : vector<1x4x1xf32>
    %17 = math.rsqrt %16 : vector<1x4x1xf32>
    %18 = arith.mulf %14, %17 : vector<1x4x1xf32>
    %c0_10 = arith.constant 0 : index
    %c0_11 = arith.constant 0 : index
    %c0_12 = arith.constant 0 : index
    %19 = vector.load %arg3[%c0_10, %c0_11, %c0_12] : memref<1x4x1xf32, #tpu.memory_space<vmem>>, vector<1x4x1xf32>
    %20 = arith.mulf %7, %18 : vector<1x4x1xf32>
    %21 = arith.subf %19, %20 : vector<1x4x1xf32>
    %22 = vector.broadcast %18 : vector<1x4x1xf32> to vector<2x4x256xf32>
    %23 = arith.mulf %0, %22 : vector<2x4x256xf32>
    %24 = vector.broadcast %21 : vector<1x4x1xf32> to vector<2x4x256xf32>
    %25 = arith.addf %23, %24 : vector<2x4x256xf32>
    %cst_13 = arith.constant 5.000000e-01 : f32
    %26 = vector.broadcast %cst_13 : f32 to vector<2x4x256xf32>
    %27 = arith.mulf %26, %25 : vector<2x4x256xf32>
    %28 = math.tanh %27 : vector<2x4x256xf32>
    %cst_14 = arith.constant 1.000000e+00 : f32
    %29 = vector.broadcast %cst_14 : f32 to vector<2x4x256xf32>
    %30 = arith.addf %28, %29 : vector<2x4x256xf32>
    %cst_15 = arith.constant 5.000000e-01 : f32
    %31 = vector.broadcast %cst_15 : f32 to vector<2x4x256xf32>
    %32 = arith.mulf %31, %30 : vector<2x4x256xf32>
    %33 = arith.mulf %32, %0 : vector<2x4x256xf32>
    %c0_16 = arith.constant 0 : index
    %c0_17 = arith.constant 0 : index
    %c0_18 = arith.constant 0 : index
    %34 = vector.load %arg4[%c0_16, %c0_17, %c0_18] : memref<2x4x256xf32, #tpu.memory_space<vmem>>, vector<2x4x256xf32>
    tpu.vector_store %arg4[%c0_16, %c0_17, %c0_18], %33 {strides = array<i32>} : memref<2x4x256xf32, #tpu.memory_space<vmem>>, vector<2x4x256xf32>,
    return
  }
  func.func @transform_0(%arg0: i32) -> (i32, i32, i32) {
    %c0_i32 = arith.constant 0 : i32
    %c0_i32_0 = arith.constant 0 : i32
    %c0_i32_1 = arith.constant 0 : i32
    return %c0_i32, %arg0, %c0_i32_0 : i32, i32, i32
  }
  func.func @transform_1(%arg0: i32) -> (i32, i32, i32) {
    %c0_i32 = arith.constant 0 : i32
    %c0_i32_0 = arith.constant 0 : i32
    %c0_i32_1 = arith.constant 0 : i32
    return %c0_i32, %arg0, %c0_i32_0 : i32, i32, i32
  }
  func.func @transform_2(%arg0: i32) -> (i32, i32, i32) {
    %c0_i32 = arith.constant 0 : i32
    %c0_i32_0 = arith.constant 0 : i32
    %c0_i32_1 = arith.constant 0 : i32
    return %c0_i32, %arg0, %c0_i32_0 : i32, i32, i32
  }
  func.func @transform_3(%arg0: i32) -> (i32, i32, i32) {
    %c0_i32 = arith.constant 0 : i32
    %c0_i32_0 = arith.constant 0 : i32
    %c0_i32_1 = arith.constant 0 : i32
    return %c0_i32, %arg0, %c0_i32_0 : i32, i32, i32
  }
}

</mosaic_0001>

<bundles_post_ra>
// kernel: tpu_custom_call.1
= control target key start
LH: loop header
LB: loop body
LE: loop exit
PB: predicated region body
PF: predicated region fallthrough
CT: control target
= control target key end

     0   :  { %8 = vsyncpa [#allocation3], 0  ;;  %s286_s0 = inlined_call_operand.hbm [shape: f32[2,4,256], index: 0, kind: input, shape index: {}]   ;;  %s287_s1 = inlined_call_operand.vmem [shape: f32[1,4,1], index: 1, kind: input, shape index: {}]   ;;  %s288_s2 = inlined_call_operand.vmem [shape: f32[1,4,1], index: 2, kind: input, shape index: {}]   ;;  %s289_s3 = inlined_call_operand.hbm [shape: f32[2,4,256], index: 3, kind: output, shape index: {}]  }
   0x1   :  { %9 = vsyncpa [#allocation4], 0  ;;  %s14_s14 = sshll.u32 %s286_s0, 4  ;;  %s220_s15 = smov [#allocation2]   ;;  %s15_s14 = int_to_ptr.hbm [resolvable:$true] %s14_s14 }
   0x2   :  { %s16_s16 = sshll.u32 %s220_s15, 4  ;;  %s221_s17 = smov 128   ;;  %s17_s16 = int_to_ptr.vmem [resolvable:$true] %s16_s16 }
   0x3   :  { %s222_s18 = smov 8  }
   0x4   :  { %22 = dma.hbm_to_vmem [thread:$0]  %s15_s14, 256, %s17_s16, [#allocation3], %s221_s17, %s221_s17, %s222_s18  }
   0x5   :  { %216 = dma.done.wait [#allocation3], 256  }
   0x6   :  { %217 = vsyncadd [#allocation3], 4294967040  ;;  %v252_v0 = vld [vmem:[#allocation2] sm:$0xff]  ;;  %v254_v1 = vld [vmem:[#allocation2 + $0x8] sm:$0xff]  ;;  %vm46_vm0 = vcmask 1043456   ;;  %v223_v26 = vmov 0  }
   0x7   :  { %35 = vst [vmem:[#allocation1] ss:$2 sm:$0xff] %v252_v0  ;;  %v56_v2 = vmul.f32 %v252_v0, %v252_v0  ;;  %v57_v3 = vmul.f32 %v254_v1, %v254_v1  ;;  %160 = vset.pattern.permute.xlu1 %v223_v26  ;;  %161 = vset.pattern.permute.xlu0 %v223_v26  ;;  %v85_v40 = vld [vmem:[%s287_s1] sm:$0xf]  ;;  %v224_v47 = vmov 839922192  }
   0x8   :  { %39 = vst [vmem:[#allocation1 + $0x10] ss:$2 sm:$0xff] %v254_v1  ;;  %v98_v45 = vld [vmem:[%s288_s2] sm:$0xf]  ;;  %v106_v48 = vunpack.c.l.s4 %v224_v47  ;;  %s225_s1 = smov [#allocation5]   ;;  %s141_s24 = sshll.u32 %s289_s3, 4  ;;  %s142_s24 = int_to_ptr.hbm [resolvable:$true] %s141_s24 }
   0x9   :  { %s139_s2 = sshll.u32 %s225_s1, 4  ;;  %s140_s2 = int_to_ptr.vmem [resolvable:$true] %s139_s2 }
   0xa   :  { %v107_v50 = vunpack.c.0.s8 %v106_v48 }
   0xe   :  { %v36_v4 = vld.sshfl [vmem:[#allocation1] sm:$0xff pattern:$0x75316420]  ;;  %v37_v5 = vld.sshfl [vmem:[#allocation1 + $0x8] sm:$0xff pattern:$0x75316420] }
   0xf   :  { %v40_v6 = vld.sshfl [vmem:[#allocation1 + $0x10] sm:$0xff pattern:$0x75316420]  ;;  %v41_v7 = vld.sshfl [vmem:[#allocation1 + $0x18] sm:$0xff pattern:$0x75316420] }
  0x10   :  { %v47_v8 = vsel %vm46_vm0, %v36_v4, 0.0  ;;  %v48_v9 = vsel %vm46_vm0, %v37_v5, 0.0  ;;  %v50_v10 = vsel %vm46_vm0, %v40_v6, 0.0  ;;  %60 = vst [vmem:[#allocation1] ss:$2 sm:$0xff] %v56_v2  ;;  %v52_v12 = vsel %vm46_vm0, %v41_v7, 0.0 }
  0x11   :  { %v49_v11 = vadd.f32 %v48_v9, %v47_v8  ;;  %64 = vst [vmem:[#allocation1 + $0x10] ss:$2 sm:$0xff] %v57_v3 }
  0x13   :  { %v51_v13 = vadd.f32 %v50_v10, %v49_v11 }
  0x15   :  { %v53_v14 = vadd.f32 %v52_v12, %v51_v13 }
  0x17   :  { %54 = vadd.xlane.f32.xlu0 %v53_v14  ;;  %v61_v15 = vld.sshfl [vmem:[#allocation1] sm:$0xff pattern:$0x75316420]  ;;  %v62_v16 = vld.sshfl [vmem:[#allocation1 + $0x8] sm:$0xff pattern:$0x75316420] }
  0x18   :  { %v65_v17 = vld.sshfl [vmem:[#allocation1 + $0x10] sm:$0xff pattern:$0x75316420]  ;;  %v66_v18 = vld.sshfl [vmem:[#allocation1 + $0x18] sm:$0xff pattern:$0x75316420] }
  0x19   :  { %v71_v19 = vsel %vm46_vm0, %v61_v15, 0.0  ;;  %v72_v20 = vsel %vm46_vm0, %v62_v16, 0.0  ;;  %v74_v21 = vsel %vm46_vm0, %v65_v17, 0.0  ;;  %v76_v23 = vsel %vm46_vm0, %v66_v18, 0.0 }
  0x1a   :  { %v73_v22 = vadd.f32 %v72_v20, %v71_v19 }
  0x1c   :  { %v75_v24 = vadd.f32 %v74_v21, %v73_v22 }
  0x1e   :  { %v77_v25 = vadd.f32 %v76_v23, %v75_v24 }
  0x20   :  { %78 = vadd.xlane.f32.xlu0 %v77_v25 }
  0x8a   :  { %v55_v27 = vpop.xlane.xlu0 %54 }
  0x8b   :  { %v80_v28 = vmul.f32 0.001953125, %v55_v27 }
  0x8d   :  { %v82_v30 = vmul.f32 %v80_v28, %v80_v28 }
  0x93   :  { %v79_v29 = vpop.xlane.xlu0 %78 }
  0x94   :  { %v81_v31 = vmul.f32 0.001953125, %v79_v29 }
  0x96   :  { %v83_v32 = vsub.f32 %v81_v31, %v82_v30 }
  0x98   :  { %v84_v33 = vmax.f32 %v83_v32, 0.0 }
  0x9a   :  { %v86_v34 = vadd.f32 1e-05, %v84_v33 }
  0x9c   :  { %162 = vrsqrt.f32 %v86_v34  ;;  %vm93_vm2 = vweird.f32 %v86_v34 }
  0xa2   :  { %v163_v35 = vpop.eup %162 }
  0xa3   :  { %v88_v36 = vmul.f32 %v163_v35, %v86_v34  ;;  %vm94_vm1 = vweird.f32 %v163_v35 }
  0xa4   :  { %vm95_vm3 = vmor %vm93_vm2, %vm94_vm1 }
  0xa5   :  { %v89_v37 = vmul.f32 %v163_v35, %v88_v36 }
  0xa7   :  { %v90_v38 = vmul.f32 0.5, %v89_v37 }
  0xa9   :  { %v91_v39 = vsub.f32 1.5, %v90_v38 }
  0xab   :  { %v92_v41 = vmul.f32 %v163_v35, %v91_v39 }
  0xad   :  { %v96_v42 = vsel %vm95_vm3, %v163_v35, %v92_v41 }
  0xae   :  { %v97_v43 = vmul.f32 %v96_v42, %v85_v40 }
  0xb0   :  { %103 = vperm.xlu1 %160, %v97_v43   ;;  %v99_v44 = vmul.f32 %v97_v43, %v80_v28 }
  0xb2   :  { %v100_v46 = vsub.f32 %v98_v45, %v99_v44 }
  0xb8   :  { %114 = vperm.xlu1 %160, %v100_v46  }
 0x122   :  { %v104_v49 = vpop.permute.xlu1 %103 }
 0x123   :  { %v108_v51 = vperm.slane %v104_v49, %v107_v50 }
 0x125   :  { %v110_v53 = vmul.f32 %v108_v51, %v252_v0  ;;  %v111_v54 = vmul.f32 %v108_v51, %v254_v1 }
 0x12a   :  { %v115_v52 = vpop.permute.xlu1 %114 }
 0x12b   :  { %v119_v55 = vperm.slane %v115_v52, %v107_v50 }
 0x12d   :  { %v121_v56 = vadd.f32 %v119_v55, %v110_v53  ;;  %v122_v57 = vadd.f32 %v119_v55, %v111_v54 }
 0x12f   :  { %v123_v58 = vmul.f32 0.5, %v121_v56  ;;  %v124_v59 = vmul.f32 0.5, %v122_v57 }
 0x131   :  { %164 = vtanh.f32 %v123_v58 }
 0x132   :  { %166 = vtanh.f32 %v124_v59 }
 0x137   :  { %v165_v60 = vpop.eup %164 }
 0x138   :  { %v167_v61 = vpop.eup %166  ;;  %v127_v62 = vadd.f32 1.0, %v165_v60 }
 0x139   :  { %v128_v63 = vadd.f32 1.0, %v167_v61 }
 0x13a   :  { %v129_v2 = vmul.f32 0.5, %v127_v62 }
 0x13b   :  { %v130_v3 = vmul.f32 0.5, %v128_v63 }
 0x13c   :  { %v131_v4 = vmul.f32 %v129_v2, %v252_v0 }
 0x13d   :  { %v132_v5 = vmul.f32 %v130_v3, %v254_v1 }
 0x13e   :  { %133 = vst [vmem:[#allocation5] sm:$0xff] %v131_v4 }
 0x13f   :  { %134 = vst [vmem:[#allocation5 + $0x8] sm:$0xff] %v132_v5 }
 0x140   :  { %147 = dma.vmem_to_hbm [thread:$0]  %s140_s2, 256, %s142_s24, [#allocation4], %s221_s17, %s221_s17, %s222_s18  }
 0x141   :  { %218 = dma.done.wait [#allocation4], 256  }
 0x142   :  { %219 = vsyncadd [#allocation4], 4294967040 }
 0x143   :  { %152 = vsyncpa [#allocation3], 1 }
 0x144   :  { %153 = vsyncpa [#allocation4], 1 }

</bundles_post_ra>
